<compile_context>
chip_gen: v7x
topology: tpu7x:2x2x1
jax: 0.10.0
libtpu: 0.0.40
codegen_flags: <defaults>
</compile_context>

<pallas_src>
import functools

import jax
import jax.numpy as jnp
from jax import lax
from jax.experimental import pallas as pl
from jax.experimental.pallas import tpu as pltpu

_LANES = 128
_MAX_ROWS = 64  # sublane rows per grid step (per-class tile = 32 KiB f32)


def _dice_kernel(pred_ref, tgt_ref, out_ref, e_ref, acc_ref, *,
                 n_class, smooth, hw, tile_px):
    # pred_ref: (1, C, T, 128)  logits tile for one batch element
    # tgt_ref : (1, T, 128)     int32 labels tile (padded pixels hold n_class)
    # out_ref : (1, C, 1)       per-class dice loss, written only at finalize
    # e_ref   : (C, T, 128)     VMEM scratch for exp(logit - max)
    # acc_ref : (2, C, 128)     VMEM lane-partial accumulators [0]=intersect [1]=union
    j = pl.program_id(1)

    @pl.when(j == 0)
    def _init():
        acc_ref[...] = jnp.zeros_like(acc_ref)

    tgt = tgt_ref[0]                                        # (T, 128) int32
    t_rows = tgt.shape[0]

    # Positional validity mask: exactly excludes wrapper-added spatial padding.
    row = lax.broadcasted_iota(jnp.int32, (t_rows, _LANES), 0)
    lane = lax.broadcasted_iota(jnp.int32, (t_rows, _LANES), 1)
    pix = j * tile_px + row * _LANES + lane
    valid = pix < hw                                        # (T, 128) bool

    # Channel max: element-wise across per-class (T, 128) slices (pure VALU).
    m = pred_ref[0, 0].astype(jnp.float32)
    for c in range(1, n_class):
        m = jnp.maximum(m, pred_ref[0, c].astype(jnp.float32))

    # exp + softmax denominator; stash exp in VMEM scratch (one exp/pixel/class).
    denom = None
    for c in range(n_class):
        e = jnp.exp(pred_ref[0, c].astype(jnp.float32) - m)
        e_ref[c] = e
        denom = e if denom is None else denom + e

    # 1/denominator, zeroed on padded pixels so they drop out of every sum.
    # (v6e option: approx=True to move the divide fully onto the EUP.)
    inv = jnp.where(valid, pl.reciprocal(denom, approx=False), 0.0)

    # Per-class partial sums: reduce over sublanes (XLU), accumulate per lane.
    for c in range(n_class):
        soft = e_ref[c] * inv                               # masked softmax prob
        mask = tgt == c                                     # pad class never matches
        isect_row = jnp.sum(jnp.where(mask, soft, 0.0), axis=0, keepdims=True)
        union_row = (jnp.sum(soft, axis=0, keepdims=True)
                     + jnp.sum(mask.astype(jnp.float32), axis=0, keepdims=True))
        acc_ref[0, c:c + 1, :] += isect_row
        acc_ref[1, c:c + 1, :] += union_row

    @pl.when(j == pl.num_programs(1) - 1)
    def _finalize():
        isect_tot = jnp.sum(acc_ref[0], axis=1, keepdims=True)   # (C, 1)
        union_tot = jnp.sum(acc_ref[1], axis=1, keepdims=True)   # (C, 1)
        dice = 1.0 - (2.0 * isect_tot + smooth) / (union_tot + smooth)
        out_ref[...] = dice[None, :, :]                          # (1, C, 1)


def dice_loss(predict, target, *, ignore_index=0, smooth=1.0):
    """DiceLoss.forward: predict (N, C, H, W) logits, target (N, H, W) int labels."""
    N, C, H, W = predict.shape
    HW = H * W

    # Spatial tiling: HW -> (S rows, 128 lanes), T rows per grid step.
    S = pl.cdiv(HW, _LANES)
    if S <= _MAX_ROWS:
        t_rows = S
        s_pad = S
    else:
        t_rows = _MAX_ROWS                          # multiple of 8
        s_pad = pl.cdiv(S, t_rows) * t_rows
    n_tiles = s_pad // t_rows
    hw_pad = s_pad * _LANES

    pred = predict.reshape(N, C, HW)                # keep caller dtype (bf16 ok)
    tgt = target.reshape(N, HW).astype(jnp.int32)
    if hw_pad != HW:
        pred = jnp.pad(pred, ((0, 0), (0, 0), (0, hw_pad - HW)))
        tgt = jnp.pad(tgt, ((0, 0), (0, hw_pad - HW)), constant_values=C)
    pred = pred.reshape(N, C, s_pad, _LANES)
    tgt = tgt.reshape(N, s_pad, _LANES)

    kernel = functools.partial(
        _dice_kernel, n_class=C, smooth=float(smooth),
        hw=HW, tile_px=t_rows * _LANES)

    # (v5e: consider pipeline_mode=pl.Buffered(3) on the pred spec if the DMA
    #  is still exposed after tiling.)
    dice_nc1 = pl.pallas_call(
        kernel,
        out_shape=jax.ShapeDtypeStruct((N, C, 1), jnp.float32),
        grid=(N, n_tiles),
        in_specs=[
            pl.BlockSpec((1, C, t_rows, _LANES), lambda i, j: (i, 0, j, 0)),
            pl.BlockSpec((1, t_rows, _LANES), lambda i, j: (i, j, 0)),
        ],
        out_specs=pl.BlockSpec((1, C, 1), lambda i, j: (i, 0, 0)),
        scratch_shapes=[
            pltpu.VMEM((C, t_rows, _LANES), jnp.float32),   # exp staging
            pltpu.VMEM((2, C, _LANES), jnp.float32),        # intersect/union acc
        ],
        compiler_params=pltpu.CompilerParams(
            dimension_semantics=("parallel", "arbitrary"),
            vmem_limit_bytes=32 * 1024 * 1024),
    )(pred, tgt)

    dice_nc = dice_nc1[..., 0]                      # (N, C)
    per_class = jnp.mean(dice_nc, axis=0)           # (C,)
    if ignore_index is None:
        return jnp.sum(per_class) / C
    keep = jnp.arange(C) != ignore_index
    return jnp.sum(jnp.where(keep, per_class, 0.0)) / (C - 1)


def _dice_loss_ref(predict, target, *, ignore_index=0, smooth=1.0):
    """Pure-JAX reference mirroring the PyTorch module."""
    N, C, H, W = predict.shape
    soft = jax.nn.softmax(predict.astype(jnp.float32), axis=1)
    loss = 0.0
    for i in range(C):
        if i == ignore_index:
            continue
        p = soft[:, i, :, :].reshape(N, -1)
        t = (target == i).astype(jnp.float32).reshape(N, -1)
        intersect = 2.0 * jnp.sum(p * t, axis=1) + smooth
        union = jnp.sum(p + t, axis=1) + smooth
        loss += jnp.mean(1.0 - intersect / union)
    return loss / (C - 1)


if __name__ == "__main__":
    key = jax.random.PRNGKey(0)
    k1, k2 = jax.random.split(key)
    N, C, H, W = 2, 4, 16, 16
    predict = jax.random.normal(k1, (N, C, H, W), dtype=jnp.float32)
    target = jax.random.randint(k2, (N, H, W), 0, C, dtype=jnp.int32)

    out = dice_loss(predict, target, ignore_index=0, smooth=1.0)
    out = jax.block_until_ready(out)

    ref = _dice_loss_ref(predict, target, ignore_index=0, smooth=1.0)
    assert jnp.allclose(out, ref, atol=1e-5, rtol=1e-5), (out, ref)
    print("KERNEL_OK")
</pallas_src>

<mosaic_0001>
module attributes {stable_mosaic.version = 11 : i64} {
  func.func @_dice_kernel(%arg0: i32, %arg1: i32, %arg2: memref<1x4x2x128xf32, #tpu.memory_space<vmem>>, %arg3: memref<1x2x128xi32, #tpu.memory_space<vmem>>, %arg4: memref<1x4x1xf32, #tpu.memory_space<vmem>>, %arg5: memref<4x2x128xf32, #tpu.memory_space<vmem>>, %arg6: memref<2x4x128xf32, #tpu.memory_space<vmem>>) attributes {dimension_semantics = [#tpu.dimension_semantics<parallel>, #tpu.dimension_semantics<arbitrary>], iteration_bounds = array<i64: 2, 1>, scalar_prefetch = 0 : i64, scratch_operands = 2 : i64, tpu.core_type = #tpu.core_type<tc>, window_params = [{transform_indices = @transform_0, window_bounds = array<i64: 1, 4, 2, 128>}, {transform_indices = @transform_1, window_bounds = array<i64: 1, 2, 128>}, {transform_indices = @transform_2, window_bounds = array<i64: 1, 4, 1>}]} {
    %c0_i32 = arith.constant 0 : i32
    %0 = arith.cmpi eq, %arg1, %c0_i32 : i32
    %1 = arith.extui %0 : i1 to i32
    %c0_i32_0 = arith.constant 0 : i32
    %2 = arith.cmpi ne, %1, %c0_i32_0 : i32
    scf.if %2 {
      %cst_124 = arith.constant 0.000000e+00 : f32
      %175 = vector.broadcast %cst_124 : f32 to vector<2x4x128xf32>
      %c0_125 = arith.constant 0 : index
      %c0_126 = arith.constant 0 : index
      %c0_127 = arith.constant 0 : index
      %176 = vector.load %arg6[%c0_125, %c0_126, %c0_127] : memref<2x4x128xf32, #tpu.memory_space<vmem>>, vector<2x4x128xf32>
      tpu.vector_store %arg6[%c0_125, %c0_126, %c0_127], %175 {strides = array<i32>} : memref<2x4x128xf32, #tpu.memory_space<vmem>>, vector<2x4x128xf32>,
    } else {
    }
    %c0 = arith.constant 0 : index
    %c0_1 = arith.constant 0 : index
    %c0_2 = arith.constant 0 : index
    %3 = vector.load %arg3[%c0, %c0_1, %c0_2] : memref<1x2x128xi32, #tpu.memory_space<vmem>>, vector<1x2x128xi32>
    %4 = vector.shape_cast %3 : vector<1x2x128xi32> to vector<2x128xi32>
    %5 = tpu.iota {dimensions = array<i32: 0>} : vector<2x128xi32>
    %6 = tpu.iota {dimensions = array<i32: 1>} : vector<2x128xi32>
    %c256_i32 = arith.constant 256 : i32
    %7 = arith.muli %arg1, %c256_i32 : i32
    %c128_i32 = arith.constant 128 : i32
    %8 = vector.broadcast %c128_i32 : i32 to vector<2x128xi32>
    %9 = arith.muli %5, %8 : vector<2x128xi32>
    %10 = vector.broadcast %7 : i32 to vector<2x128xi32>
    %11 = arith.addi %10, %9 : vector<2x128xi32>
    %12 = arith.addi %11, %6 : vector<2x128xi32>
    %c256_i32_3 = arith.constant 256 : i32
    %13 = vector.broadcast %c256_i32_3 : i32 to vector<2x128xi32>
    %14 = arith.cmpi slt, %12, %13 : vector<2x128xi32>
    %c0_4 = arith.constant 0 : index
    %c0_5 = arith.constant 0 : index
    %c0_6 = arith.constant 0 : index
    %c0_7 = arith.constant 0 : index
    %15 = vector.load %arg2[%c0_4, %c0_5, %c0_6, %c0_7] : memref<1x4x2x128xf32, #tpu.memory_space<vmem>>, vector<1x1x2x128xf32>
    %16 = vector.shape_cast %15 : vector<1x1x2x128xf32> to vector<2x128xf32>
    %c0_8 = arith.constant 0 : index
    %c1 = arith.constant 1 : index
    %c0_9 = arith.constant 0 : index
    %c0_10 = arith.constant 0 : index
    %17 = vector.load %arg2[%c0_8, %c1, %c0_9, %c0_10] : memref<1x4x2x128xf32, #tpu.memory_space<vmem>>, vector<1x1x2x128xf32>
    %18 = vector.shape_cast %17 : vector<1x1x2x128xf32> to vector<2x128xf32>
    %19 = arith.maximumf %16, %18 : vector<2x128xf32>
    %c0_11 = arith.constant 0 : index
    %c2 = arith.constant 2 : index
    %c0_12 = arith.constant 0 : index
    %c0_13 = arith.constant 0 : index
    %20 = vector.load %arg2[%c0_11, %c2, %c0_12, %c0_13] : memref<1x4x2x128xf32, #tpu.memory_space<vmem>>, vector<1x1x2x128xf32>
    %21 = vector.shape_cast %20 : vector<1x1x2x128xf32> to vector<2x128xf32>
    %22 = arith.maximumf %19, %21 : vector<2x128xf32>
    %c0_14 = arith.constant 0 : index
    %c3 = arith.constant 3 : index
    %c0_15 = arith.constant 0 : index
    %c0_16 = arith.constant 0 : index
    %23 = vector.load %arg2[%c0_14, %c3, %c0_15, %c0_16] : memref<1x4x2x128xf32, #tpu.memory_space<vmem>>, vector<1x1x2x128xf32>
    %24 = vector.shape_cast %23 : vector<1x1x2x128xf32> to vector<2x128xf32>
    %25 = arith.maximumf %22, %24 : vector<2x128xf32>
    %c0_17 = arith.constant 0 : index
    %c0_18 = arith.constant 0 : index
    %c0_19 = arith.constant 0 : index
    %c0_20 = arith.constant 0 : index
    %26 = vector.load %arg2[%c0_17, %c0_18, %c0_19, %c0_20] : memref<1x4x2x128xf32, #tpu.memory_space<vmem>>, vector<1x1x2x128xf32>
    %27 = vector.shape_cast %26 : vector<1x1x2x128xf32> to vector<2x128xf32>
    %28 = arith.subf %27, %25 : vector<2x128xf32>
    %29 = math.exp %28 : vector<2x128xf32>
    %c0_21 = arith.constant 0 : index
    %c0_22 = arith.constant 0 : index
    %c0_23 = arith.constant 0 : index
    %30 = vector.load %arg5[%c0_21, %c0_22, %c0_23] : memref<4x2x128xf32, #tpu.memory_space<vmem>>, vector<1x2x128xf32>
    %31 = vector.shape_cast %30 : vector<1x2x128xf32> to vector<2x128xf32>
    %32 = vector.shape_cast %29 : vector<2x128xf32> to vector<1x2x128xf32>
    tpu.vector_store %arg5[%c0_21, %c0_22, %c0_23], %32 {strides = array<i32>} : memref<4x2x128xf32, #tpu.memory_space<vmem>>, vector<1x2x128xf32>,
    %c0_24 = arith.constant 0 : index
    %c1_25 = arith.constant 1 : index
    %c0_26 = arith.constant 0 : index
    %c0_27 = arith.constant 0 : index
    %33 = vector.load %arg2[%c0_24, %c1_25, %c0_26, %c0_27] : memref<1x4x2x128xf32, #tpu.memory_space<vmem>>, vector<1x1x2x128xf32>
    %34 = vector.shape_cast %33 : vector<1x1x2x128xf32> to vector<2x128xf32>
    %35 = arith.subf %34, %25 : vector<2x128xf32>
    %36 = math.exp %35 : vector<2x128xf32>
    %c1_28 = arith.constant 1 : index
    %c0_29 = arith.constant 0 : index
    %c0_30 = arith.constant 0 : index
    %37 = vector.load %arg5[%c1_28, %c0_29, %c0_30] : memref<4x2x128xf32, #tpu.memory_space<vmem>>, vector<1x2x128xf32>
    %38 = vector.shape_cast %37 : vector<1x2x128xf32> to vector<2x128xf32>
    %39 = vector.shape_cast %36 : vector<2x128xf32> to vector<1x2x128xf32>
    tpu.vector_store %arg5[%c1_28, %c0_29, %c0_30], %39 {strides = array<i32>} : memref<4x2x128xf32, #tpu.memory_space<vmem>>, vector<1x2x128xf32>,
    %40 = arith.addf %29, %36 : vector<2x128xf32>
    %c0_31 = arith.constant 0 : index
    %c2_32 = arith.constant 2 : index
    %c0_33 = arith.constant 0 : index
    %c0_34 = arith.constant 0 : index
    %41 = vector.load %arg2[%c0_31, %c2_32, %c0_33, %c0_34] : memref<1x4x2x128xf32, #tpu.memory_space<vmem>>, vector<1x1x2x128xf32>
    %42 = vector.shape_cast %41 : vector<1x1x2x128xf32> to vector<2x128xf32>
    %43 = arith.subf %42, %25 : vector<2x128xf32>
    %44 = math.exp %43 : vector<2x128xf32>
    %c2_35 = arith.constant 2 : index
    %c0_36 = arith.constant 0 : index
    %c0_37 = arith.constant 0 : index
    %45 = vector.load %arg5[%c2_35, %c0_36, %c0_37] : memref<4x2x128xf32, #tpu.memory_space<vmem>>, vector<1x2x128xf32>
    %46 = vector.shape_cast %45 : vector<1x2x128xf32> to vector<2x128xf32>
    %47 = vector.shape_cast %44 : vector<2x128xf32> to vector<1x2x128xf32>
    tpu.vector_store %arg5[%c2_35, %c0_36, %c0_37], %47 {strides = array<i32>} : memref<4x2x128xf32, #tpu.memory_space<vmem>>, vector<1x2x128xf32>,
    %48 = arith.addf %40, %44 : vector<2x128xf32>
    %c0_38 = arith.constant 0 : index
    %c3_39 = arith.constant 3 : index
    %c0_40 = arith.constant 0 : index
    %c0_41 = arith.constant 0 : index
    %49 = vector.load %arg2[%c0_38, %c3_39, %c0_40, %c0_41] : memref<1x4x2x128xf32, #tpu.memory_space<vmem>>, vector<1x1x2x128xf32>
    %50 = vector.shape_cast %49 : vector<1x1x2x128xf32> to vector<2x128xf32>
    %51 = arith.subf %50, %25 : vector<2x128xf32>
    %52 = math.exp %51 : vector<2x128xf32>
    %c3_42 = arith.constant 3 : index
    %c0_43 = arith.constant 0 : index
    %c0_44 = arith.constant 0 : index
    %53 = vector.load %arg5[%c3_42, %c0_43, %c0_44] : memref<4x2x128xf32, #tpu.memory_space<vmem>>, vector<1x2x128xf32>
    %54 = vector.shape_cast %53 : vector<1x2x128xf32> to vector<2x128xf32>
    %55 = vector.shape_cast %52 : vector<2x128xf32> to vector<1x2x128xf32>
    tpu.vector_store %arg5[%c3_42, %c0_43, %c0_44], %55 {strides = array<i32>} : memref<4x2x128xf32, #tpu.memory_space<vmem>>, vector<1x2x128xf32>,
    %56 = arith.addf %48, %52 : vector<2x128xf32>
    %57 = tpu.reciprocal %56 : vector<2x128xf32> -> vector<2x128xf32>
    %cst = arith.constant 0.000000e+00 : f32
    %58 = vector.broadcast %cst : f32 to vector<2x128xf32>
    %59 = arith.select %14, %57, %58 : vector<2x128xi1>, vector<2x128xf32>
    %c0_45 = arith.constant 0 : index
    %c0_46 = arith.constant 0 : index
    %c0_47 = arith.constant 0 : index
    %60 = vector.load %arg5[%c0_45, %c0_46, %c0_47] : memref<4x2x128xf32, #tpu.memory_space<vmem>>, vector<1x2x128xf32>
    %61 = vector.shape_cast %60 : vector<1x2x128xf32> to vector<2x128xf32>
    %62 = arith.mulf %61, %59 : vector<2x128xf32>
    %c0_i32_48 = arith.constant 0 : i32
    %63 = vector.broadcast %c0_i32_48 : i32 to vector<2x128xi32>
    %64 = arith.cmpi eq, %4, %63 : vector<2x128xi32>
    %cst_49 = arith.constant 0.000000e+00 : f32
    %65 = vector.broadcast %cst_49 : f32 to vector<2x128xf32>
    %66 = arith.select %64, %62, %65 : vector<2x128xi1>, vector<2x128xf32>
    %cst_50 = arith.constant dense<0.000000e+00> : vector<128xf32>
    %67 = vector.multi_reduction <add>, %66, %cst_50 [0] : vector<2x128xf32> to vector<128xf32>
    %68 = vector.shape_cast %67 : vector<128xf32> to vector<1x128xf32>
    %cst_51 = arith.constant dense<0.000000e+00> : vector<128xf32>
    %69 = vector.multi_reduction <add>, %62, %cst_51 [0] : vector<2x128xf32> to vector<128xf32>
    %70 = vector.shape_cast %69 : vector<128xf32> to vector<1x128xf32>
    %71 = arith.extui %64 : vector<2x128xi1> to vector<2x128xi32>
    %72 = arith.sitofp %71 : vector<2x128xi32> to vector<2x128xf32>
    %cst_52 = arith.constant dense<0.000000e+00> : vector<128xf32>
    %73 = vector.multi_reduction <add>, %72, %cst_52 [0] : vector<2x128xf32> to vector<128xf32>
    %74 = vector.shape_cast %73 : vector<128xf32> to vector<1x128xf32>
    %75 = arith.addf %70, %74 : vector<1x128xf32>
    %c0_53 = arith.constant 0 : index
    %c0_54 = arith.constant 0 : index
    %c0_55 = arith.constant 0 : index
    %76 = vector.load %arg6[%c0_53, %c0_54, %c0_55] : memref<2x4x128xf32, #tpu.memory_space<vmem>>, vector<1x1x128xf32>
    %77 = vector.shape_cast %76 : vector<1x1x128xf32> to vector<1x128xf32>
    %78 = arith.addf %77, %68 : vector<1x128xf32>
    %c0_56 = arith.constant 0 : index
    %c0_57 = arith.constant 0 : index
    %c0_58 = arith.constant 0 : index
    %79 = vector.load %arg6[%c0_56, %c0_57, %c0_58] : memref<2x4x128xf32, #tpu.memory_space<vmem>>, vector<1x1x128xf32>
    %80 = vector.shape_cast %79 : vector<1x1x128xf32> to vector<1x128xf32>
    %81 = vector.shape_cast %78 : vector<1x128xf32> to vector<1x1x128xf32>
    tpu.vector_store %arg6[%c0_56, %c0_57, %c0_58], %81 {strides = array<i32>} : memref<2x4x128xf32, #tpu.memory_space<vmem>>, vector<1x1x128xf32>,
    %c1_59 = arith.constant 1 : index
    %c0_60 = arith.constant 0 : index
    %c0_61 = arith.constant 0 : index
    %82 = vector.load %arg6[%c1_59, %c0_60, %c0_61] : memref<2x4x128xf32, #tpu.memory_space<vmem>>, vector<1x1x128xf32>
    %83 = vector.shape_cast %82 : vector<1x1x128xf32> to vector<1x128xf32>
    %84 = arith.addf %83, %75 : vector<1x128xf32>
    %c1_62 = arith.constant 1 : index
    %c0_63 = arith.constant 0 : index
    %c0_64 = arith.constant 0 : index
    %85 = vector.load %arg6[%c1_62, %c0_63, %c0_64] : memref<2x4x128xf32, #tpu.memory_space<vmem>>, vector<1x1x128xf32>
    %86 = vector.shape_cast %85 : vector<1x1x128xf32> to vector<1x128xf32>
    %87 = vector.shape_cast %84 : vector<1x128xf32> to vector<1x1x128xf32>
    tpu.vector_store %arg6[%c1_62, %c0_63, %c0_64], %87 {strides = array<i32>} : memref<2x4x128xf32, #tpu.memory_space<vmem>>, vector<1x1x128xf32>,
    %c1_65 = arith.constant 1 : index
    %c0_66 = arith.constant 0 : index
    %c0_67 = arith.constant 0 : index
    %88 = vector.load %arg5[%c1_65, %c0_66, %c0_67] : memref<4x2x128xf32, #tpu.memory_space<vmem>>, vector<1x2x128xf32>
    %89 = vector.shape_cast %88 : vector<1x2x128xf32> to vector<2x128xf32>
    %90 = arith.mulf %89, %59 : vector<2x128xf32>
    %c1_i32 = arith.constant 1 : i32
    %91 = vector.broadcast %c1_i32 : i32 to vector<2x128xi32>
    %92 = arith.cmpi eq, %4, %91 : vector<2x128xi32>
    %cst_68 = arith.constant 0.000000e+00 : f32
    %93 = vector.broadcast %cst_68 : f32 to vector<2x128xf32>
    %94 = arith.select %92, %90, %93 : vector<2x128xi1>, vector<2x128xf32>
    %cst_69 = arith.constant dense<0.000000e+00> : vector<128xf32>
    %95 = vector.multi_reduction <add>, %94, %cst_69 [0] : vector<2x128xf32> to vector<128xf32>
    %96 = vector.shape_cast %95 : vector<128xf32> to vector<1x128xf32>
    %cst_70 = arith.constant dense<0.000000e+00> : vector<128xf32>
    %97 = vector.multi_reduction <add>, %90, %cst_70 [0] : vector<2x128xf32> to vector<128xf32>
    %98 = vector.shape_cast %97 : vector<128xf32> to vector<1x128xf32>
    %99 = arith.extui %92 : vector<2x128xi1> to vector<2x128xi32>
    %100 = arith.sitofp %99 : vector<2x128xi32> to vector<2x128xf32>
    %cst_71 = arith.constant dense<0.000000e+00> : vector<128xf32>
    %101 = vector.multi_reduction <add>, %100, %cst_71 [0] : vector<2x128xf32> to vector<128xf32>
    %102 = vector.shape_cast %101 : vector<128xf32> to vector<1x128xf32>
    %103 = arith.addf %98, %102 : vector<1x128xf32>
    %c0_72 = arith.constant 0 : index
    %c1_73 = arith.constant 1 : index
    %c0_74 = arith.constant 0 : index
    %104 = vector.load %arg6[%c0_72, %c1_73, %c0_74] : memref<2x4x128xf32, #tpu.memory_space<vmem>>, vector<1x1x128xf32>
    %105 = vector.shape_cast %104 : vector<1x1x128xf32> to vector<1x128xf32>
    %106 = arith.addf %105, %96 : vector<1x128xf32>
    %c0_75 = arith.constant 0 : index
    %c1_76 = arith.constant 1 : index
    %c0_77 = arith.constant 0 : index
    %107 = vector.load %arg6[%c0_75, %c1_76, %c0_77] : memref<2x4x128xf32, #tpu.memory_space<vmem>>, vector<1x1x128xf32>
    %108 = vector.shape_cast %107 : vector<1x1x128xf32> to vector<1x128xf32>
    %109 = vector.shape_cast %106 : vector<1x128xf32> to vector<1x1x128xf32>
    tpu.vector_store %arg6[%c0_75, %c1_76, %c0_77], %109 {strides = array<i32>} : memref<2x4x128xf32, #tpu.memory_space<vmem>>, vector<1x1x128xf32>,
    %c1_78 = arith.constant 1 : index
    %c1_79 = arith.constant 1 : index
    %c0_80 = arith.constant 0 : index
    %110 = vector.load %arg6[%c1_78, %c1_79, %c0_80] : memref<2x4x128xf32, #tpu.memory_space<vmem>>, vector<1x1x128xf32>
    %111 = vector.shape_cast %110 : vector<1x1x128xf32> to vector<1x128xf32>
    %112 = arith.addf %111, %103 : vector<1x128xf32>
    %c1_81 = arith.constant 1 : index
    %c1_82 = arith.constant 1 : index
    %c0_83 = arith.constant 0 : index
    %113 = vector.load %arg6[%c1_81, %c1_82, %c0_83] : memref<2x4x128xf32, #tpu.memory_space<vmem>>, vector<1x1x128xf32>
    %114 = vector.shape_cast %113 : vector<1x1x128xf32> to vector<1x128xf32>
    %115 = vector.shape_cast %112 : vector<1x128xf32> to vector<1x1x128xf32>
    tpu.vector_store %arg6[%c1_81, %c1_82, %c0_83], %115 {strides = array<i32>} : memref<2x4x128xf32, #tpu.memory_space<vmem>>, vector<1x1x128xf32>,
    %c2_84 = arith.constant 2 : index
    %c0_85 = arith.constant 0 : index
    %c0_86 = arith.constant 0 : index
    %116 = vector.load %arg5[%c2_84, %c0_85, %c0_86] : memref<4x2x128xf32, #tpu.memory_space<vmem>>, vector<1x2x128xf32>
    %117 = vector.shape_cast %116 : vector<1x2x128xf32> to vector<2x128xf32>
    %118 = arith.mulf %117, %59 : vector<2x128xf32>
    %c2_i32 = arith.constant 2 : i32
    %119 = vector.broadcast %c2_i32 : i32 to vector<2x128xi32>
    %120 = arith.cmpi eq, %4, %119 : vector<2x128xi32>
    %cst_87 = arith.constant 0.000000e+00 : f32
    %121 = vector.broadcast %cst_87 : f32 to vector<2x128xf32>
    %122 = arith.select %120, %118, %121 : vector<2x128xi1>, vector<2x128xf32>
    %cst_88 = arith.constant dense<0.000000e+00> : vector<128xf32>
    %123 = vector.multi_reduction <add>, %122, %cst_88 [0] : vector<2x128xf32> to vector<128xf32>
    %124 = vector.shape_cast %123 : vector<128xf32> to vector<1x128xf32>
    %cst_89 = arith.constant dense<0.000000e+00> : vector<128xf32>
    %125 = vector.multi_reduction <add>, %118, %cst_89 [0] : vector<2x128xf32> to vector<128xf32>
    %126 = vector.shape_cast %125 : vector<128xf32> to vector<1x128xf32>
    %127 = arith.extui %120 : vector<2x128xi1> to vector<2x128xi32>
    %128 = arith.sitofp %127 : vector<2x128xi32> to vector<2x128xf32>
    %cst_90 = arith.constant dense<0.000000e+00> : vector<128xf32>
    %129 = vector.multi_reduction <add>, %128, %cst_90 [0] : vector<2x128xf32> to vector<128xf32>
    %130 = vector.shape_cast %129 : vector<128xf32> to vector<1x128xf32>
    %131 = arith.addf %126, %130 : vector<1x128xf32>
    %c0_91 = arith.constant 0 : index
    %c2_92 = arith.constant 2 : index
    %c0_93 = arith.constant 0 : index
    %132 = vector.load %arg6[%c0_91, %c2_92, %c0_93] : memref<2x4x128xf32, #tpu.memory_space<vmem>>, vector<1x1x128xf32>
    %133 = vector.shape_cast %132 : vector<1x1x128xf32> to vector<1x128xf32>
    %134 = arith.addf %133, %124 : vector<1x128xf32>
    %c0_94 = arith.constant 0 : index
    %c2_95 = arith.constant 2 : index
    %c0_96 = arith.constant 0 : index
    %135 = vector.load %arg6[%c0_94, %c2_95, %c0_96] : memref<2x4x128xf32, #tpu.memory_space<vmem>>, vector<1x1x128xf32>
    %136 = vector.shape_cast %135 : vector<1x1x128xf32> to vector<1x128xf32>
    %137 = vector.shape_cast %134 : vector<1x128xf32> to vector<1x1x128xf32>
    tpu.vector_store %arg6[%c0_94, %c2_95, %c0_96], %137 {strides = array<i32>} : memref<2x4x128xf32, #tpu.memory_space<vmem>>, vector<1x1x128xf32>,
    %c1_97 = arith.constant 1 : index
    %c2_98 = arith.constant 2 : index
    %c0_99 = arith.constant 0 : index
    %138 = vector.load %arg6[%c1_97, %c2_98, %c0_99] : memref<2x4x128xf32, #tpu.memory_space<vmem>>, vector<1x1x128xf32>
    %139 = vector.shape_cast %138 : vector<1x1x128xf32> to vector<1x128xf32>
    %140 = arith.addf %139, %131 : vector<1x128xf32>
    %c1_100 = arith.constant 1 : index
    %c2_101 = arith.constant 2 : index
    %c0_102 = arith.constant 0 : index
    %141 = vector.load %arg6[%c1_100, %c2_101, %c0_102] : memref<2x4x128xf32, #tpu.memory_space<vmem>>, vector<1x1x128xf32>
    %142 = vector.shape_cast %141 : vector<1x1x128xf32> to vector<1x128xf32>
    %143 = vector.shape_cast %140 : vector<1x128xf32> to vector<1x1x128xf32>
    tpu.vector_store %arg6[%c1_100, %c2_101, %c0_102], %143 {strides = array<i32>} : memref<2x4x128xf32, #tpu.memory_space<vmem>>, vector<1x1x128xf32>,
    %c3_103 = arith.constant 3 : index
    %c0_104 = arith.constant 0 : index
    %c0_105 = arith.constant 0 : index
    %144 = vector.load %arg5[%c3_103, %c0_104, %c0_105] : memref<4x2x128xf32, #tpu.memory_space<vmem>>, vector<1x2x128xf32>
    %145 = vector.shape_cast %144 : vector<1x2x128xf32> to vector<2x128xf32>
    %146 = arith.mulf %145, %59 : vector<2x128xf32>
    %c3_i32 = arith.constant 3 : i32
    %147 = vector.broadcast %c3_i32 : i32 to vector<2x128xi32>
    %148 = arith.cmpi eq, %4, %147 : vector<2x128xi32>
    %cst_106 = arith.constant 0.000000e+00 : f32
    %149 = vector.broadcast %cst_106 : f32 to vector<2x128xf32>
    %150 = arith.select %148, %146, %149 : vector<2x128xi1>, vector<2x128xf32>
    %cst_107 = arith.constant dense<0.000000e+00> : vector<128xf32>
    %151 = vector.multi_reduction <add>, %150, %cst_107 [0] : vector<2x128xf32> to vector<128xf32>
    %152 = vector.shape_cast %151 : vector<128xf32> to vector<1x128xf32>
    %cst_108 = arith.constant dense<0.000000e+00> : vector<128xf32>
    %153 = vector.multi_reduction <add>, %146, %cst_108 [0] : vector<2x128xf32> to vector<128xf32>
    %154 = vector.shape_cast %153 : vector<128xf32> to vector<1x128xf32>
    %155 = arith.extui %148 : vector<2x128xi1> to vector<2x128xi32>
    %156 = arith.sitofp %155 : vector<2x128xi32> to vector<2x128xf32>
    %cst_109 = arith.constant dense<0.000000e+00> : vector<128xf32>
    %157 = vector.multi_reduction <add>, %156, %cst_109 [0] : vector<2x128xf32> to vector<128xf32>
    %158 = vector.shape_cast %157 : vector<128xf32> to vector<1x128xf32>
    %159 = arith.addf %154, %158 : vector<1x128xf32>
    %c0_110 = arith.constant 0 : index
    %c3_111 = arith.constant 3 : index
    %c0_112 = arith.constant 0 : index
    %160 = vector.load %arg6[%c0_110, %c3_111, %c0_112] : memref<2x4x128xf32, #tpu.memory_space<vmem>>, vector<1x1x128xf32>
    %161 = vector.shape_cast %160 : vector<1x1x128xf32> to vector<1x128xf32>
    %162 = arith.addf %161, %152 : vector<1x128xf32>
    %c0_113 = arith.constant 0 : index
    %c3_114 = arith.constant 3 : index
    %c0_115 = arith.constant 0 : index
    %163 = vector.load %arg6[%c0_113, %c3_114, %c0_115] : memref<2x4x128xf32, #tpu.memory_space<vmem>>, vector<1x1x128xf32>
    %164 = vector.shape_cast %163 : vector<1x1x128xf32> to vector<1x128xf32>
    %165 = vector.shape_cast %162 : vector<1x128xf32> to vector<1x1x128xf32>
    tpu.vector_store %arg6[%c0_113, %c3_114, %c0_115], %165 {strides = array<i32>} : memref<2x4x128xf32, #tpu.memory_space<vmem>>, vector<1x1x128xf32>,
    %c1_116 = arith.constant 1 : index
    %c3_117 = arith.constant 3 : index
    %c0_118 = arith.constant 0 : index
    %166 = vector.load %arg6[%c1_116, %c3_117, %c0_118] : memref<2x4x128xf32, #tpu.memory_space<vmem>>, vector<1x1x128xf32>
    %167 = vector.shape_cast %166 : vector<1x1x128xf32> to vector<1x128xf32>
    %168 = arith.addf %167, %159 : vector<1x128xf32>
    %c1_119 = arith.constant 1 : index
    %c3_120 = arith.constant 3 : index
    %c0_121 = arith.constant 0 : index
    %169 = vector.load %arg6[%c1_119, %c3_120, %c0_121] : memref<2x4x128xf32, #tpu.memory_space<vmem>>, vector<1x1x128xf32>
    %170 = vector.shape_cast %169 : vector<1x1x128xf32> to vector<1x128xf32>
    %171 = vector.shape_cast %168 : vector<1x128xf32> to vector<1x1x128xf32>
    tpu.vector_store %arg6[%c1_119, %c3_120, %c0_121], %171 {strides = array<i32>} : memref<2x4x128xf32, #tpu.memory_space<vmem>>, vector<1x1x128xf32>,
    %c0_i32_122 = arith.constant 0 : i32
    %172 = arith.cmpi eq, %arg1, %c0_i32_122 : i32
    %173 = arith.extui %172 : i1 to i32
    %c0_i32_123 = arith.constant 0 : i32
    %174 = arith.cmpi ne, %173, %c0_i32_123 : i32
    scf.if %174 {
      %c0_124 = arith.constant 0 : index
      %c0_125 = arith.constant 0 : index
      %c0_126 = arith.constant 0 : index
      %175 = vector.load %arg6[%c0_124, %c0_125, %c0_126] : memref<2x4x128xf32, #tpu.memory_space<vmem>>, vector<1x4x128xf32>
      %176 = vector.shape_cast %175 : vector<1x4x128xf32> to vector<4x128xf32>
      %cst_127 = arith.constant dense<0.000000e+00> : vector<4xf32>
      %177 = vector.multi_reduction <add>, %176, %cst_127 [1] : vector<4x128xf32> to vector<4xf32>
      %178 = vector.shape_cast %177 : vector<4xf32> to vector<4x1xf32>
      %c1_128 = arith.constant 1 : index
      %c0_129 = arith.constant 0 : index
      %c0_130 = arith.constant 0 : index
      %179 = vector.load %arg6[%c1_128, %c0_129, %c0_130] : memref<2x4x128xf32, #tpu.memory_space<vmem>>, vector<1x4x128xf32>
      %180 = vector.shape_cast %179 : vector<1x4x128xf32> to vector<4x128xf32>
      %cst_131 = arith.constant dense<0.000000e+00> : vector<4xf32>
      %181 = vector.multi_reduction <add>, %180, %cst_131 [1] : vector<4x128xf32> to vector<4xf32>
      %182 = vector.shape_cast %181 : vector<4xf32> to vector<4x1xf32>
      %cst_132 = arith.constant 2.000000e+00 : f32
      %183 = vector.broadcast %cst_132 : f32 to vector<4x1xf32>
      %184 = arith.mulf %183, %178 : vector<4x1xf32>
      %cst_133 = arith.constant 1.000000e+00 : f32
      %185 = vector.broadcast %cst_133 : f32 to vector<4x1xf32>
      %186 = arith.addf %184, %185 : vector<4x1xf32>
      %cst_134 = arith.constant 1.000000e+00 : f32
      %187 = vector.broadcast %cst_134 : f32 to vector<4x1xf32>
      %188 = arith.addf %182, %187 : vector<4x1xf32>
      %189 = arith.divf %186, %188 : vector<4x1xf32>
      %cst_135 = arith.constant 1.000000e+00 : f32
      %190 = vector.broadcast %cst_135 : f32 to vector<4x1xf32>
      %191 = arith.subf %190, %189 : vector<4x1xf32>
      %192 = vector.shape_cast %191 : vector<4x1xf32> to vector<1x4x1xf32>
      %c0_136 = arith.constant 0 : index
      %c0_137 = arith.constant 0 : index
      %c0_138 = arith.constant 0 : index
      %193 = vector.load %arg4[%c0_136, %c0_137, %c0_138] : memref<1x4x1xf32, #tpu.memory_space<vmem>>, vector<1x4x1xf32>
      tpu.vector_store %arg4[%c0_136, %c0_137, %c0_138], %192 {strides = array<i32>} : memref<1x4x1xf32, #tpu.memory_space<vmem>>, vector<1x4x1xf32>,
    } else {
    }
    return
  }
  func.func @transform_0(%arg0: i32, %arg1: i32) -> (i32, i32, i32, i32) {
    %c0_i32 = arith.constant 0 : i32
    %c0_i32_0 = arith.constant 0 : i32
    %c0_i32_1 = arith.constant 0 : i32
    return %arg0, %c0_i32, %arg1, %c0_i32_0 : i32, i32, i32, i32
  }
  func.func @transform_1(%arg0: i32, %arg1: i32) -> (i32, i32, i32) {
    %c0_i32 = arith.constant 0 : i32
    %c0_i32_0 = arith.constant 0 : i32
    return %arg0, %arg1, %c0_i32 : i32, i32, i32
  }
  func.func @transform_2(%arg0: i32, %arg1: i32) -> (i32, i32, i32) {
    %c0_i32 = arith.constant 0 : i32
    %c0_i32_0 = arith.constant 0 : i32
    %c0_i32_1 = arith.constant 0 : i32
    return %arg0, %c0_i32, %c0_i32_0 : i32, i32, i32
  }
}

</mosaic_0001>

<bundles_post_ra>
// kernel: tpu_custom_call.1
= control target key start
LH: loop header
LB: loop body
LE: loop exit
PB: predicated region body
PF: predicated region fallthrough
CT: control target
= control target key end

     0   :  { %7 = vsyncpa [#allocation5], 0  ;;  %s963_s0 = inlined_call_operand.hbm [shape: f32[2,4,2,128], index: 0, kind: input, shape index: {}]   ;;  %s964_s1 = inlined_call_operand.hbm [shape: s32[2,2,128], index: 1, kind: input, shape index: {}]   ;;  %s965_s2 = inlined_call_operand.vmem [shape: f32[2,4,1], index: 2, kind: output, shape index: {}]  }
   0x1   :  { %9 = vsyncpa [#allocation5 + $0x1], 0 }
   0x2   :  { %10 = vsyncpa [#allocation7], 0 }
   0x3   :  { %12 = vsyncpa [#allocation7 + $0x1], 0  ;;  %s765_s9 = smov 0   ;;  %s767_s10 = smov 0  }
   0x4   :  { %s769_s11 = smov 0   ;;  %s771_s12 = smov 0  }
   0x5   :  { %s773_s13 = smov 0   ;;  %s775_s14 = smov 0  }
   0x6 LB: > { %s528_s15 = sadd.s32 4294967295, %s743_s14   ;;  %s30_s16 = sadd.s32 1, %s739_s13  ;;  %s743_s14 = sphi %s775_s14, %s18_s14   ;;  %s739_s13 = sphi %s773_s13, %s977_s13   ;;  %s735_s12 = sphi %s771_s12, %s976_s12   ;;  %s731_s11 = sphi %s769_s11, %s975_s11   ;;  %s727_s10 = sphi %s767_s10, %s974_s10   ;;  %s723_s9 = sphi %s765_s9, %s973_s9  }
   0x7   : > { %p32_p0 = scmp.ge.s32.totalorder %s30_s16, 2  ;;  %s39_s17 = sadd.s32 1, %s731_s11 }
   0x8   : > { %p46_p1 = scmp.ne.s32.totalorder %s731_s11, %s727_s10  ;;  %p47_p2 = scmp.eq.s32.totalorder %s743_s14, 0 }
   0x9   : > { %s979_s16 = smov (%p32_p0, %s30_s16), 0  ;;  %p52_p4 = scmp.ne.s32.totalorder %s727_s10, %s723_s9 }
   0xa   : > { %p801_p3 = por %p47_p2, %p46_p1  ;;  %s34_s19 = ssub.s32 %s739_s13, %s979_s16 }
   0xb   : > { %p53_p5 = scmp.eq.s32.totalorder %s528_s15, 0  ;;  %p37_p6 = scmp.eq.s32.totalorder %s34_s19, 0 }
   0xc   : > { %p565_p8 = scmp.lt.s32.totalorder %s743_s14, 2  ;;  %s817_s22 = sand.u32 1, %s731_s11  }
   0xd   : > { %p808_p7 = por %p53_p5, %p52_p4  ;;  %s553_s23 = sshll.u32 %s739_s13, 7 }
   0xe   : > { %s814_s21 = scalar_select %p37_p6, %s731_s11, %s39_s17  }
   0xf   : > { %s968_s20 = scalar_select %p808_p7, 1, 0 }
  0x10   : > { %s532_s24 = sshll.u32 %s817_s22, 3  ;;  %s824_s27 = scalar_lea.hbm %s963_s0, %s553_s23 }
  0x11   : > { %s134_s28 = scalar_lea.vmem [#allocation4], %s532_s24  ;;  %p828_p9 = pnand %p565_p8, %p801_p3 }
  0x12   : > { %s142_s29 = sshll.u32 %s134_s28, 4  ;;  %s131_s3 = scalar_lea.sflag [#allocation5], %s817_s22  ;;  %s832_s29 = int_to_ptr.vmem [resolvable:$true] %s142_s29 }
  0x13   : > { %s629_s4 = scalar_lea.hbm %s824_s27, 128  ;;  %p631_p11 = pneg %p828_p9 }
  0x14   : > { %p630_p10 = scmp.ne.s32.totalorder %s824_s27, %s629_s4  ;;  %s634_s7 = scalar_lea.hbm %s963_s0, 256 }
  0x15   : > { %p635_p0 = scmp.lt.u32.totalorder %s824_s27, %s963_s0  ;;  %p636_p1 = scmp.lt.u32.totalorder %s634_s7, %s629_s4 }
  0x16   : > { %p632_p12 = pnand %p631_p11, %p630_p10  ;;  %p638_p3 = scmp.lt.u32.totalorder %s629_s4, %s824_s27 }
  0x17   : > { %p637_p2 = por %p636_p1, %p635_p0 }
  0x18   : > { %p633_p13 = pneg %p632_p12 }
  0x19   : > { %p639_p4 = por %p638_p3, %p637_p2 }
  0x1b   : > { %p640_p5 = pnand %p639_p4, %p633_p13 }
  0x1d   : > { %643 = shalt.err (!%p640_p5)
}
  0x1e   : > { %s644_s15 = scalar_lea.vmem %s832_s29, 128  ;;  %s745_s17 = smov [#allocation4]  }
  0x1f   : > { %p645_p6 = scmp.ne.s32.totalorder %s832_s29, %s644_s15  ;;  %s649_s18 = sshll.u32 %s745_s17, 4  ;;  %s650_s18 = int_to_ptr.vmem [resolvable:$false] %s649_s18 }
  0x20   : > { %s651_s19 = scalar_lea.vmem %s650_s18, 256  ;;  %p652_p12 = scmp.lt.s32.totalorder %s832_s29, %s650_s18 }
  0x21   : > { %p647_p8 = pnand %p645_p6, %p631_p11  ;;  %p653_p0 = scmp.lt.s32.totalorder %s651_s19, %s644_s15 }
  0x23   : > { %p648_p10 = pneg %p647_p8  ;;  %p654_p1 = por %p653_p0, %p652_p12 }
  0x25   : > { %p655_p2 = pnand %p654_p1, %p648_p10 }
  0x27   : > { %658 = shalt.err (!%p655_p2)
}
  0x28   : > { %s746_s23 = smov 32   ;;  %s747_s24 = smov 2  }
  0x29   : > { %561 = dma.hbm_to_vmem [thread:$0]  (!%p828_p9), %s824_s27, 128, %s832_s29, %s131_s3, %s746_s23, %s746_s23, %s747_s24  }
  0x2a   : > { %p537_p13 = scmp.ge.s32.totalorder %s743_s14, 1  ;;  %p169_p3 = scmp.lt.s32.totalorder %s743_s14, 3 }
  0x2b   : > { %s535_s25 = sshll.u32 %s817_s22, 1  ;;  %s536_s28 = sshll.u32 %s739_s13, 5 }
  0x2c   : > { %p865_p4 = pnand %p537_p13, %p169_p3  ;;  %s156_s4 = scalar_lea.vmem [#allocation6], %s535_s25 }
  0x2d   : > { %s164_s5 = sshll.u32 %s156_s4, 4  ;;  %s873_s8 = scalar_lea.hbm %s964_s1, %s536_s28  ;;  %s165_s5 = int_to_ptr.vmem [resolvable:$true] %s164_s5 }
  0x2e   : > { %s970_s26 = scalar_select %p865_p4, 1, 0 }
  0x2f   : > { %s153_s27 = scalar_lea.sflag [#allocation7], %s817_s22  ;;  %s659_s29 = scalar_lea.hbm %s873_s8, 32 }
  0x30   : > { %p660_p5 = scmp.ne.s32.totalorder %s873_s8, %s659_s29  ;;  %s664_s15 = scalar_lea.hbm %s964_s1, 64 }
  0x31   : > { %p665_p10 = scmp.lt.u32.totalorder %s873_s8, %s964_s1  ;;  %p666_p12 = scmp.lt.u32.totalorder %s664_s15, %s659_s29 }
  0x32   : > { %p662_p6 = pnand %p660_p5, %p631_p11  ;;  %p668_p1 = scmp.lt.u32.totalorder %s659_s29, %s873_s8 }
  0x33   : > { %p667_p0 = por %p666_p12, %p665_p10 }
  0x34   : > { %p663_p8 = pneg %p662_p6 }
  0x35   : > { %p669_p2 = por %p668_p1, %p667_p0 }
  0x37   : > { %p670_p13 = pnand %p669_p2, %p663_p8 }
  0x39   : > { %673 = shalt.err (!%p670_p13)
}
  0x3a   : > { %s674_s22 = scalar_lea.vmem %s165_s5, 32  ;;  %s748_s19 = smov [#allocation6]  }
  0x3b   : > { %p675_p3 = scmp.ne.s32.totalorder %s165_s5, %s674_s22  ;;  %s679_s23 = sshll.u32 %s748_s19, 4  ;;  %s680_s23 = int_to_ptr.vmem [resolvable:$false] %s679_s23 }
  0x3c   : > { %s681_s24 = scalar_lea.vmem %s680_s23, 64  ;;  %p682_p7 = scmp.lt.s32.totalorder %s165_s5, %s680_s23 }
  0x3d   : > { %p677_p5 = pnand %p675_p3, %p631_p11  ;;  %p683_p4 = scmp.lt.s32.totalorder %s681_s24, %s674_s22 }
  0x3f   : > { %p678_p6 = pneg %p677_p5  ;;  %p684_p10 = por %p683_p4, %p682_p7 }
  0x41   : > { %p685_p12 = pnand %p684_p10, %p678_p6 }
  0x43   : > { %688 = shalt.err (!%p685_p12)
}
  0x44   : > { %564 = dma.hbm_to_vmem [thread:$0]  (!%p828_p9), %s873_s8, 32, %s165_s5, %s153_s27  }
  0x45   : > { %p971_p8 = scmp.ne.s32.totalorder %s970_s26, 0 }
  0x46   : > { %s175_s25 = sand.u32 (!%p971_p8), 1, %s727_s10   ;;  %p972_p11 = scmp.ne.s32.totalorder (!%p971_p8), %s968_s20, 0 }
  0x47   : > { %173 = sbr.rel (%p971_p8) target bundleno = 312 (0x138), region = 28  ;;  %s538_s28 = sshll.u32 (!%p971_p8), %s175_s25, 3 }
  0x48   : > { %s176_s4 = scalar_lea.sflag (!%p971_p8), [#allocation5], %s175_s25  ;;  %s179_s6 = scalar_lea.vmem (!%p971_p8), [#allocation4], %s538_s28 }
  0x4e   : > { %714 = dma.done.wait (%p972_p11), %s176_s4, 128  }
  0x4f   : > { %716 = vsyncadd (%p972_p11), %s176_s4, 4294967168  ;;  %s539_s7 = sshll.u32 %s175_s25, 1  ;;  %s185_s29 = scalar_lea.sflag [#allocation7], %s175_s25 }
  0x50   : > { %s188_s30 = scalar_lea.vmem [#allocation6], %s539_s7 }
  0x51   : > { %718 = dma.done.wait (%p972_p11), %s185_s29, 32  }
  0x52   : > { %720 = vsyncadd (%p972_p11), %s185_s29, 4294967264  ;;  %v749_v0 = vmov 0.0   ;;  %v234_v1 = vld [vmem:[%s179_s6] sm:$0x3]  ;;  %v541_v2 = vld [vmem:[%s179_s6 + $0x2] sm:$0x3]  ;;  %v224_v28 = vlaneseq }
  0x53   : > { %222 = vst [vmem:[#allocation3 + $0x4] sm:$0xf] %v749_v0  ;;  %221 = vst [vmem:[#allocation3] sm:$0xf] %v749_v0  ;;  %v237_v3 = vmax.f32 %v234_v1, %v541_v2  ;;  %v542_v4 = vld [vmem:[%s179_s6 + $0x4] sm:$0x3] }
  0x54   : > { %v543_v5 = vld [vmem:[%s179_s6 + $0x6] sm:$0x3]  ;;  %v544_v7 = vld [vmem:[%s179_s6 + $0x2] sm:$0x3]  ;;  %v545_v8 = vld [vmem:[%s179_s6 + $0x4] sm:$0x3] }
  0x55   : > { %v240_v6 = vmax.f32 %v237_v3, %v542_v4  ;;  %v546_v9 = vld [vmem:[%s179_s6 + $0x6] sm:$0x3]  ;;  %v906_v15 = vld [vmem:[%s188_s30] sm:$0x3]  ;;  %vm275_vm4 = vcmask 1041408   ;;  %v225_v38 = vshrl.u32 %v224_v28, 7 }
  0x56   : > { %vm273_vm0 = vcmp.eq.s32.totalorder %v906_v15, 0  ;;  %vm309_vm1 = vcmp.eq.s32.totalorder %v906_v15, 1  ;;  %vm343_vm2 = vcmp.eq.s32.totalorder %v906_v15, 2  ;;  %vm377_vm3 = vcmp.eq.s32.totalorder %v906_v15, 3  ;;  %p213_p7 = scmp.lt.s32.totalorder %s735_s12, 1 }
  0x57   : > { %v243_v10 = vmax.f32 %v240_v6, %v543_v5  ;;  %v547_v20 = vsel %vm273_vm0, 1.0, %v749_v0  ;;  %v548_v21 = vsel %vm309_vm1, 1.0, %v749_v0  ;;  %v549_v22 = vsel %vm343_vm2, 1.0, %v749_v0 }
  0x58   : > { %v550_v23 = vsel %vm377_vm3, 1.0, %v749_v0  ;;  %v292_v24 = vsel %vm275_vm4, %v547_v20, 0.0  ;;  %v327_v25 = vsel %vm275_vm4, %v548_v21, 0.0  ;;  %v361_v26 = vsel %vm275_vm4, %v549_v22, 0.0  ;;  %s981_s12 = smov (!%p213_p7, %s735_s12), 1 }
  0x59   : > { %v244_v11 = vsub.f32 %v234_v1, %v243_v10  ;;  %v249_v12 = vsub.f32 %v544_v7, %v243_v10  ;;  %v256_v13 = vsub.f32 %v545_v8, %v243_v10  ;;  %v263_v14 = vsub.f32 %v546_v9, %v243_v10  ;;  %s540_s20 = sshll.u32 %s981_s12, 2 }
  0x5a   : > { %v395_v27 = vsel %vm275_vm4, %v550_v23, 0.0  ;;  %v293_v29 = vrot.slane %v292_v24, 4  ;;  %v328_v31 = vrot.slane %v327_v25, 4  ;;  %v362_v32 = vrot.slane %v361_v26, 4  ;;  %s216_s8 = scalar_lea.vmem %s965_s2, %s540_s20 }
  0x5b   : > { %v245_v16 = vmul.f32 1.442695, %v244_v11  ;;  %v250_v17 = vmul.f32 1.442695, %v249_v12  ;;  %v257_v18 = vmul.f32 1.442695, %v256_v13 }
  0x5c   : > { %v264_v19 = vmul.f32 1.442695, %v263_v14  ;;  %v396_v33 = vrot.slane %v395_v27, 4  ;;  %v294_v39 = vadd.f32 %v293_v29, %v292_v24  ;;  %v329_v41 = vadd.f32 %v328_v31, %v327_v25 }
  0x5d   : > { %617 = vpow2.f32 %v245_v16  ;;  %v363_v42 = vadd.f32 %v362_v32, %v361_v26  ;;  %v227_v45 = vand.u32 127, %v224_v28  ;;  %v229_v46 = vmul.u32 128, %v225_v38 }
  0x5e   : > { %619 = vpow2.f32 %v250_v17  ;;  %v397_v43 = vadd.f32 %v396_v33, %v395_v27  ;;  %v295_v47 = vrot.slane %v294_v39, 2  ;;  %v330_v48 = vrot.slane %v329_v41, 2 }
  0x5f   : > { %621 = vpow2.f32 %v257_v18  ;;  %v364_v49 = vrot.slane %v363_v42, 2  ;;  %v232_v51 = vadd.s32 %v229_v46, %v227_v45  ;;  %vm413_vm6 = vcmask 1043456  }
  0x60   : > { %623 = vpow2.f32 %v264_v19  ;;  %v398_v50 = vrot.slane %v397_v43, 2  ;;  %v296_v52 = vadd.f32 %v295_v47, %v294_v39  ;;  %v331_v53 = vadd.f32 %v330_v48, %v329_v41 }
  0x61   : > { %v365_v54 = vadd.f32 %v364_v49, %v363_v42  ;;  %vm233_vm5 = vcmp.lt.s32.totalorder %v232_v51, 256  ;;  %vm427_vm7 = vcmask 3072  }
  0x62   : > { %v399_v55 = vadd.f32 %v398_v50, %v397_v43  ;;  %v297_v57 = vrot.slane %v296_v52, 1  ;;  %v332_v58 = vrot.slane %v331_v53, 1 }
  0x63   : > { %v366_v59 = vrot.slane %v365_v54, 1 }
  0x64   : > { %v400_v60 = vrot.slane %v399_v55, 1  ;;  %v298_v6 = vadd.f32 %v297_v57, %v296_v52  ;;  %v333_v7 = vadd.f32 %v332_v58, %v331_v53 }
  0x65   : > { %v367_v8 = vadd.f32 %v366_v59, %v365_v54  ;;  %v338_v59 = vld [vmem:[#allocation3 + $0x5] sm:$0x1] }
  0x66   : > { %v401_v9 = vadd.f32 %v400_v60, %v399_v55  ;;  %v304_v55 = vld [vmem:[#allocation3 + $0x4] sm:$0x1]  ;;  %v372_v60 = vld [vmem:[#allocation3 + $0x6] sm:$0x1] }
  0x67   : > { %v618_v30 = vpop.eup %617 }
  0x68   : > { %v620_v34 = vpop.eup %619  ;;  %247 = vst [vmem:[#allocation2] sm:$0x3] %v618_v30 }
  0x69   : > { %v622_v35 = vpop.eup %621  ;;  %253 = vst [vmem:[#allocation2 + $0x2] sm:$0x3] %v620_v34  ;;  %v254_v36 = vadd.f32 %v620_v34, %v618_v30 }
  0x6a   : > { %v624_v37 = vpop.eup %623  ;;  %260 = vst [vmem:[#allocation2 + $0x4] sm:$0x3] %v622_v35 }
  0x6b   : > { %v261_v40 = vadd.f32 %v622_v35, %v254_v36  ;;  %267 = vst [vmem:[#allocation2 + $0x6] sm:$0x3] %v624_v37 }
  0x6d   : > { %v268_v44 = vadd.f32 %v624_v37, %v261_v40 }
  0x6f   : > { %625 = vrcp.f32 %v268_v44  ;;  %v271_v56 = vld [vmem:[#allocation2] sm:$0x3] }
  0x70   : > { %v307_v61 = vld [vmem:[#allocation2 + $0x2] sm:$0x3] }
  0x71   : > { %v341_v62 = vld [vmem:[#allocation2 + $0x4] sm:$0x3] }
  0x72   : > { %v375_v63 = vld [vmem:[#allocation2 + $0x6] sm:$0x3] }
  0x79   : > { %v626_v0 = vpop.eup %625 }
  0x7a   : > { %v270_v1 = vsel %vm233_vm5, %v626_v0, 0.0 }
  0x7b   : > { %v272_v2 = vmul.f32 %v271_v56, %v270_v1  ;;  %v308_v3 = vmul.f32 %v307_v61, %v270_v1  ;;  %v342_v4 = vmul.f32 %v341_v62, %v270_v1  ;;  %v376_v5 = vmul.f32 %v375_v63, %v270_v1  ;;  %v406_v61 = vld [vmem:[#allocation3 + $0x7] sm:$0x1] }
  0x7d   : > { %v283_v10 = vsel %vm275_vm4, %v272_v2, 0.0  ;;  %v318_v11 = vsel %vm275_vm4, %v308_v3, 0.0  ;;  %v352_v12 = vsel %vm275_vm4, %v342_v4, 0.0  ;;  %v386_v13 = vsel %vm275_vm4, %v376_v5, 0.0 }
  0x7e   : > { %v284_v14 = vrot.slane %v283_v10, 4  ;;  %v319_v16 = vrot.slane %v318_v11, 4  ;;  %v353_v17 = vrot.slane %v352_v12, 4  ;;  %v387_v18 = vrot.slane %v386_v13, 4 }
  0x7f   : > { %v274_v19 = vsel %vm273_vm0, %v272_v2, 0.0  ;;  %v310_v20 = vsel %vm309_vm1, %v308_v3, 0.0  ;;  %v344_v21 = vsel %vm343_vm2, %v342_v4, 0.0  ;;  %v378_v22 = vsel %vm377_vm3, %v376_v5, 0.0 }
  0x80   : > { %v285_v23 = vadd.f32 %v284_v14, %v283_v10  ;;  %v320_v24 = vadd.f32 %v319_v16, %v318_v11  ;;  %v354_v25 = vadd.f32 %v353_v17, %v352_v12  ;;  %v388_v26 = vadd.f32 %v387_v18, %v386_v13  ;;  %v300_v11 = vld [vmem:[#allocation3] sm:$0x1] }
  0x81   : > { %v276_v27 = vsel %vm275_vm4, %v274_v19, 0.0  ;;  %v311_v28 = vsel %vm275_vm4, %v310_v20, 0.0  ;;  %v345_v29 = vsel %vm275_vm4, %v344_v21, 0.0  ;;  %v379_v30 = vsel %vm275_vm4, %v378_v22, 0.0  ;;  %v335_v20 = vld [vmem:[#allocation3 + $0x1] sm:$0x1] }
  0x82   : > { %v286_v31 = vrot.slane %v285_v23, 2  ;;  %v321_v32 = vrot.slane %v320_v24, 2  ;;  %v355_v33 = vrot.slane %v354_v25, 2  ;;  %v389_v34 = vrot.slane %v388_v26, 2  ;;  %v369_v21 = vld [vmem:[#allocation3 + $0x2] sm:$0x1] }
  0x83   : > { %v277_v35 = vrot.slane %v276_v27, 4  ;;  %v312_v36 = vrot.slane %v311_v28, 4  ;;  %v346_v15 = vrot.slane %v345_v29, 4  ;;  %v380_v37 = vrot.slane %v379_v30, 4  ;;  %v403_v22 = vld [vmem:[#allocation3 + $0x3] sm:$0x1] }
  0x84   : > { %v287_v38 = vadd.f32 %v286_v31, %v285_v23  ;;  %v322_v39 = vadd.f32 %v321_v32, %v320_v24  ;;  %v356_v40 = vadd.f32 %v355_v33, %v354_v25  ;;  %v390_v41 = vadd.f32 %v389_v34, %v388_v26 }
  0x85   : > { %v278_v42 = vadd.f32 %v277_v35, %v276_v27  ;;  %v313_v43 = vadd.f32 %v312_v36, %v311_v28  ;;  %v347_v44 = vadd.f32 %v346_v15, %v345_v29  ;;  %v381_v45 = vadd.f32 %v380_v37, %v379_v30 }
  0x86   : > { %v288_v46 = vrot.slane %v287_v38, 1  ;;  %v323_v47 = vrot.slane %v322_v39, 1  ;;  %v357_v48 = vrot.slane %v356_v40, 1  ;;  %v391_v49 = vrot.slane %v390_v41, 1 }
  0x87   : > { %v279_v50 = vrot.slane %v278_v42, 2  ;;  %v314_v51 = vrot.slane %v313_v43, 2  ;;  %v348_v52 = vrot.slane %v347_v44, 2  ;;  %v382_v53 = vrot.slane %v381_v45, 2 }
  0x88   : > { %v289_v54 = vadd.f32 %v288_v46, %v287_v38  ;;  %v324_v56 = vadd.f32 %v323_v47, %v322_v39  ;;  %v358_v57 = vadd.f32 %v357_v48, %v356_v40  ;;  %v392_v58 = vadd.f32 %v391_v49, %v390_v41 }
  0x89   : > { %v280_v62 = vadd.f32 %v279_v50, %v278_v42  ;;  %v315_v63 = vadd.f32 %v314_v51, %v313_v43  ;;  %v349_v0 = vadd.f32 %v348_v52, %v347_v44  ;;  %v383_v1 = vadd.f32 %v382_v53, %v381_v45 }
  0x8a   : > { %v299_v2 = vadd.f32 %v298_v6, %v289_v54  ;;  %v334_v3 = vadd.f32 %v333_v7, %v324_v56  ;;  %v368_v4 = vadd.f32 %v367_v8, %v358_v57  ;;  %v402_v5 = vadd.f32 %v401_v9, %v392_v58 }
  0x8b   : > { %v281_v10 = vrot.slane %v280_v62, 1  ;;  %v316_v12 = vrot.slane %v315_v63, 1  ;;  %v350_v13 = vrot.slane %v349_v0, 1  ;;  %v384_v14 = vrot.slane %v383_v1, 1 }
  0x8c   : > { %v305_v16 = vadd.f32 %v304_v55, %v299_v2  ;;  %v339_v17 = vadd.f32 %v338_v59, %v334_v3  ;;  %v373_v18 = vadd.f32 %v372_v60, %v368_v4  ;;  %v407_v19 = vadd.f32 %v406_v61, %v402_v5 }
  0x8d   : > { %v282_v23 = vadd.f32 %v281_v10, %v280_v62  ;;  %v317_v24 = vadd.f32 %v316_v12, %v315_v63  ;;  %v351_v25 = vadd.f32 %v350_v13, %v349_v0  ;;  %v385_v26 = vadd.f32 %v384_v14, %v383_v1 }
  0x8e   : > { %306 = vst [vmem:[#allocation3 + $0x4] sm:$0x1] %v305_v16  ;;  %340 = vst [vmem:[#allocation3 + $0x5] sm:$0x1] %v339_v17 }
  0x8f   : > { %374 = vst [vmem:[#allocation3 + $0x6] sm:$0x1] %v373_v18  ;;  %408 = vst [vmem:[#allocation3 + $0x7] sm:$0x1] %v407_v19  ;;  %v301_v6 = vadd.f32 %v300_v11, %v282_v23  ;;  %v336_v7 = vadd.f32 %v335_v20, %v317_v24  ;;  %v370_v8 = vadd.f32 %v369_v21, %v351_v25 }
  0x90   : > { %v404_v9 = vadd.f32 %v403_v22, %v385_v26 }
  0x91   : > { %302 = vst [vmem:[#allocation3] sm:$0x1] %v301_v6  ;;  %337 = vst [vmem:[#allocation3 + $0x1] sm:$0x1] %v336_v7 }
  0x92   : > { %371 = vst [vmem:[#allocation3 + $0x2] sm:$0x1] %v370_v8  ;;  %405 = vst [vmem:[#allocation3 + $0x3] sm:$0x1] %v404_v9 }
  0x96   : > { %v417_v27 = vld [vmem:[#allocation3 + $0x4] sm:$0xf] }
  0x97   : > { %v418_v28 = vsel %vm413_vm6, %v417_v27, 0.0 }
  0x98   : > { %419 = vadd.xlane.f32.xlu0 %v418_v28 }
  0x99   : > { %v412_v29 = vld [vmem:[#allocation3] sm:$0xf] }
  0x9a   : > { %v414_v30 = vsel %vm413_vm6, %v412_v29, 0.0 }
  0x9c   : > { %415 = vadd.xlane.f32.xlu0 %v414_v30 }
 0x125   : > { %v420_v31 = vpop.xlane.xlu0 %419 }
 0x126   : > { %v423_v32 = vadd.f32 1.0, %v420_v31 }
 0x128   : > { %627 = vrcp.f32 %v423_v32 }
 0x129   : > { %v416_v33 = vpop.xlane.xlu0 %415 }
 0x12a   : > { %v421_v34 = vmul.f32 2.0, %v416_v33 }
 0x12c   : > { %v422_v35 = vadd.f32 1.0, %v421_v34 }
 0x132   : > { %v628_v36 = vpop.eup %627 }
 0x133   : > { %v425_v15 = vmul.f32 %v628_v36, %v422_v35 }
 0x135   : > { %v426_v37 = vsub.f32 1.0, %v425_v15 }
 0x137   : > { %428 = vst.msk [vmem:[%s216_s8] sm:$0xf] %vm427_vm7, %v426_v37 }
 0x138 PF: > { %s18_s14 = sadd.s32 1, %s743_s14   ;;  %s973_s9 = smov %s727_s10 }
 0x139   : > { %p15_p9 = scmp.ge.s32.totalorder %s18_s14, 4   ;;  %s974_s10 = smov %s731_s11 }
 0x13a   : > { %s975_s11 = smov %s814_s21  ;;  %s976_s12 = smov %s739_s13 }
 0x13b   : > { %s977_s13 = smov %s979_s16  ;;  %17 = sbr.rel (!%p15_p9) target bundleno = 6 (0x6), region = 96 }
 0x142   :  { %448 = vsyncpa [#allocation5], 1 }
 0x143   :  { %450 = vsyncpa [#allocation5 + $0x1], 1 }
 0x144   :  { %451 = vsyncpa [#allocation7], 1 }
 0x145   :  { %453 = vsyncpa [#allocation7 + $0x1], 1 }

</bundles_post_ra>
